<compile_context>
chip_gen: v6e
topology: v6e:2x2x1
jax: 0.10.0
libtpu: 0.0.40
codegen_flags: <defaults>
</compile_context>

<pallas_src>
import jax
import jax.numpy as jnp
import numpy as np
from jax import lax
from jax.experimental import pallas as pl
from jax.experimental.pallas import tpu as pltpu

_C = 16          # conv1 output channels
_NPOLY = 4       # 2x2 polyphase components


# ------------------------------------------------------------------
# Single fused kernel, one grid point per image.
#   p_ref    : (4S, S*9)    conv1 im2col patches, rows=(group k, row a), lanes=(col b, tap)
#   w1k_ref  : (S*9, S*C)   kron(I_S, BN-folded conv1 weight)
#   b1_ref   : (1, S*C)
#   w2c_ref  : (S*C, 3*S*C) [oy=-1 | oy=0 | oy=+1] logit-conv block matrices
#   b2_ref   : (1, S*C)
#   m0/m1    : (4S, 1)      zero-pad masks for the oy=-1 / oy=+1 row rolls
#   pavg_ref : (S*C, C)     (col, channel) -> channel spatial-average matrix
#   pw3_ref  : (S*C, 1)     pavg @ w3 (spatial mean fused with the 1x1 logit conv)
#   gsum_ref : (4, 4S)      per-polyphase-group row-sum matrix
#   fcw/fcb  : (C, 10) / (1, 10)
#   o_ref    : (1, 10)
# ------------------------------------------------------------------
def _fused_kernel(p_ref, w1k_ref, b1_ref, w2c_ref, b2_ref, m0_ref, m1_ref,
                  pavg_ref, pw3_ref, gsum_ref, fcw_ref, fcb_ref, o_ref):
    f32 = jnp.float32
    sc = w1k_ref.shape[1]            # S*C  (= 128 lanes)
    g = gsum_ref.shape[0]            # 4 polyphase components
    rows = p_ref.shape[0]            # 4*S activation rows

    # conv1 (circular pad + BN pre-folded) + LeakyReLU(0.1); lane-dense in VMEM.
    z = jnp.dot(p_ref[...], w1k_ref[...], preferred_element_type=f32) + b1_ref[...]
    y = jnp.where(z > 0, z, 0.1 * z)                                   # (4S, S*C)

    # AdaptiveAvgPool2d((1,1)) of every polyphase component: Gsum @ (y @ Pavg).
    pooled = jnp.dot(gsum_ref[...],
                     jnp.dot(y, pavg_ref[...], preferred_element_type=f32),
                     preferred_element_type=f32)                       # (4, C)

    # LPS logit-net 3x3 conv (zero pad): ONE wide MXU matmul, row offsets via XLU rolls.
    hw = jnp.dot(y, w2c_ref[...], preferred_element_type=f32)          # (4S, 3*S*C)
    h = hw[:, sc:2 * sc]                                               # oy = 0
    h = h + m0_ref[...] * pltpu.roll(hw[:, 0:sc], shift=1, axis=0)          # oy = -1
    h = h + m1_ref[...] * pltpu.roll(hw[:, 2 * sc:3 * sc], shift=rows - 1, axis=0)  # oy = +1
    h = jnp.maximum(h + b2_ref[...], 0.0)                              # (4S, S*C)

    # Per-component logit: spatial mean fused with the 1x1 16->1 conv (w3 folded into pavg).
    # b3 omitted: a bias common to all components cannot change the argmax below.
    lg = jnp.dot(gsum_ref[...],
                 jnp.dot(h, pw3_ref[...], preferred_element_type=f32),
                 preferred_element_type=f32)                           # (4, 1)

    # Hard polyphase selection (torch.argmax semantics: first index wins ties).
    kidx = lax.broadcasted_iota(jnp.int32, (g, 1), 0)
    mx = jnp.max(lg, axis=0, keepdims=True)
    kstar = jnp.min(jnp.where(lg >= mx, kidx, g), axis=0, keepdims=True)
    sel = (kidx == kstar).astype(f32)                                  # (4, 1) one-hot
    feat = jnp.sum(sel * pooled, axis=0, keepdims=True)                # (1, C)

    # fc + F.normalize(p=2, dim=1)  (rsqrt -> EUP slot).
    out = jnp.dot(feat, fcw_ref[...], preferred_element_type=f32) + fcb_ref[...]
    ss = jnp.sum(out * out, axis=1, keepdims=True)
    o_ref[...] = out * lax.rsqrt(jnp.maximum(ss, 1e-24))


def _const_spec(arr):
    nd = arr.ndim
    return pl.BlockSpec(arr.shape, lambda i, _nd=nd: (0,) * _nd)


def simple_cnn1_forward(x_nchw, consts):
    """Forward pass. `consts` must come from make_constants() (built once)."""
    n, cin, hh, ww = x_nchw.shape
    s = hh // 2
    out_dim = consts["fcw"].shape[1]

    # im2col via a single precomputed gather (circular pad + taps + polyphase split).
    x = x_nchw[:, 0, :, :].reshape(n, hh * ww).astype(jnp.float32)
    patches = jnp.take(x, consts["idx"], axis=1)                       # (N, 4S, S*9)

    weights = (consts["w1k"], consts["b1"], consts["w2cat"], consts["b2"],
               consts["m0"], consts["m1"], consts["pavg"], consts["pw3"],
               consts["gsum"], consts["fcw"], consts["fcb"])

    out = pl.pallas_call(
        _fused_kernel,
        out_shape=jax.ShapeDtypeStruct((n, 1, out_dim), jnp.float32),
        grid=(n,),
        in_specs=[pl.BlockSpec((None, _NPOLY * s, s * 9), lambda i: (i, 0, 0))]
                 + [_const_spec(a) for a in weights],
        out_specs=pl.BlockSpec((None, 1, out_dim), lambda i: (i, 0, 0)),
        compiler_params=pltpu.CompilerParams(dimension_semantics=("parallel",)),
    )(patches, *weights)
    return out.reshape(n, out_dim)


# ------------------------------------------------------------------
# One-time host-side (numpy) constant construction: BN fold + conv taps / zero
# padding baked into small block matrices + im2col gather indices.
# ------------------------------------------------------------------
def _patch_indices(hh, ww):
    s = hh // 2
    idx = np.empty((_NPOLY * s, s * 9), np.int32)
    for k in range(_NPOLY):
        i, j = divmod(k, 2)
        for a in range(s):
            for b in range(s):
                for dy in range(3):
                    for dx in range(3):
                        yy = (2 * a + i + dy - 1) % hh          # circular padding
                        xx = (2 * b + j + dx - 1) % ww
                        idx[k * s + a, b * 9 + dy * 3 + dx] = yy * ww + xx
    return idx


def make_constants(params, hh, ww):
    f32 = np.float32
    s = hh // 2
    c = _C

    w1 = np.asarray(params["w1"], f32)
    b1 = np.asarray(params["b1"], f32)
    bns = np.asarray(params["bn_scale"], f32)
    bnh = np.asarray(params["bn_shift"], f32)
    w1eff = w1 * bns                                            # (9, C)  BN folded
    b1eff = b1 * bns + bnh                                      # (1, C)
    w1k = np.kron(np.eye(s, dtype=f32), w1eff)                  # (S*9, S*C)
    b1big = np.tile(b1eff, (1, s))                              # (1, S*C)

    w2 = np.asarray(params["w2"], f32)                          # (9, C, C)
    blocks = []
    for oy in (-1, 0, 1):
        acc = np.zeros((s * c, s * c), f32)
        for ox in (-1, 0, 1):
            t = (oy + 1) * 3 + (ox + 1)
            acc += np.kron(np.eye(s, k=-ox, dtype=f32), w2[t])  # zero col-pad baked in
        blocks.append(acc)
    w2cat = np.concatenate(blocks, axis=1)                      # (S*C, 3*S*C)
    b2big = np.tile(np.asarray(params["b2"], f32), (1, s))      # (1, S*C)

    rows = _NPOLY * s
    ridx = np.arange(rows) % s
    m0 = (ridx != 0).astype(f32)[:, None]                       # zero row crossed by oy=-1 roll
    m1 = (ridx != s - 1).astype(f32)[:, None]                   # zero row crossed by oy=+1 roll

    pavg = np.kron(np.ones((s, 1), f32), np.eye(c, dtype=f32)) / float(s * s)   # (S*C, C)
    pw3 = pavg @ np.asarray(params["w3"], f32)                  # (S*C, 1)
    gsum = np.kron(np.eye(_NPOLY, dtype=f32), np.ones((1, s), f32))              # (4, 4S)

    return {
        "idx": jnp.asarray(_patch_indices(hh, ww)),
        "w1k": jnp.asarray(w1k), "b1": jnp.asarray(b1big),
        "w2cat": jnp.asarray(w2cat), "b2": jnp.asarray(b2big),
        "m0": jnp.asarray(m0), "m1": jnp.asarray(m1),
        "pavg": jnp.asarray(pavg), "pw3": jnp.asarray(pw3),
        "gsum": jnp.asarray(gsum),
        "fcw": jnp.asarray(params["fcw"]).astype(jnp.float32),
        "fcb": jnp.asarray(params["fcb"]).astype(jnp.float32),
    }


# ------------------------------------------------------------------
# Pure-JAX reference of the same forward math (for correctness checking).
# ------------------------------------------------------------------
def reference_forward(x_nchw, params):
    n, cin, hh, ww = x_nchw.shape
    x = x_nchw[:, 0, :, :].astype(jnp.float32)
    xp = jnp.pad(x, ((0, 0), (1, 1), (1, 1)), mode="wrap")
    p1 = jnp.stack([xp[:, dy:dy + hh, dx:dx + ww] for dy in range(3) for dx in range(3)],
                   axis=-1).reshape(n * hh * ww, 9)
    z = p1 @ params["w1"] + params["b1"]
    z = z * params["bn_scale"] + params["bn_shift"]
    y = jnp.where(z > 0, z, 0.1 * z).reshape(n, hh, ww, _C)
    comps = jnp.stack([y[:, i::2, j::2, :] for i in (0, 1) for j in (0, 1)], axis=1)
    h2, w2sp = hh // 2, ww // 2
    cflat = comps.reshape(n * _NPOLY, h2, w2sp, _C)
    cpad = jnp.pad(cflat, ((0, 0), (1, 1), (1, 1), (0, 0)))
    p2 = jnp.concatenate([cpad[:, dy:dy + h2, dx:dx + w2sp, :]
                          for dy in range(3) for dx in range(3)], axis=-1)
    p2 = p2.reshape(n * _NPOLY * h2 * w2sp, 9 * _C)
    h = jnp.maximum(p2 @ params["w2"].reshape(9 * _C, _C) + params["b2"], 0.0)
    logits = (h @ params["w3"] + params["b3"]).reshape(n, _NPOLY, h2 * w2sp).mean(-1)
    kstar = jnp.argmax(logits, axis=1)
    pooled = comps.mean(axis=(2, 3))                                        # (N, 4, C)
    feat = jnp.take_along_axis(pooled, kstar[:, None, None], axis=1)[:, 0, :]
    out = feat @ params["fcw"] + params["fcb"]
    nrm = jnp.sqrt(jnp.sum(out * out, axis=1, keepdims=True))
    return out / jnp.maximum(nrm, 1e-12)


if __name__ == "__main__":
    # Deterministic example input (PyTorch NCHW = (2, 1, 16, 16)).
    x = jax.random.normal(jax.random.PRNGKey(0), (2, 1, 16, 16), jnp.float32)

    # Deterministic synthetic parameters (shapes implied by SimpleCNN1.__init__).
    ks = jax.random.split(jax.random.PRNGKey(42), 12)
    params = {
        "w1": 0.3 * jax.random.normal(ks[0], (9, _C), jnp.float32),        # conv1 1->16, 3x3 (tap-major)
        "b1": 0.05 * jax.random.normal(ks[1], (1, _C), jnp.float32),
        # TODO(synk): LPSLogitLayers / set_pool source is unavailable; the LPS logit
        # network is approximated as conv3x3(16->16)+ReLU -> conv1x1(16->1) -> spatial mean.
        "w2": 0.1 * jax.random.normal(ks[6], (9, _C, _C), jnp.float32),    # logit conv 16->16, 3x3
        "b2": 0.05 * jax.random.normal(ks[7], (1, _C), jnp.float32),
        "w3": 0.2 * jax.random.normal(ks[8], (_C, 1), jnp.float32),        # logit conv 16->1, 1x1
        "b3": 0.05 * jax.random.normal(ks[9], (1, 1), jnp.float32),
        "fcw": 0.2 * jax.random.normal(ks[10], (_C, 10), jnp.float32),     # Linear(16, dimensions=10)
        "fcb": 0.05 * jax.random.normal(ks[11], (1, 10), jnp.float32),
    }
    # BatchNorm2d(16) in eval mode, folded to per-channel scale/shift.
    gamma = 1.0 + 0.1 * jax.random.normal(ks[2], (1, _C), jnp.float32)
    beta = 0.05 * jax.random.normal(ks[3], (1, _C), jnp.float32)
    rmean = 0.1 * jax.random.normal(ks[4], (1, _C), jnp.float32)
    rvar = 0.5 + jax.random.uniform(ks[5], (1, _C), jnp.float32)
    params["bn_scale"] = gamma / jnp.sqrt(rvar + 1e-5)
    params["bn_shift"] = beta - rmean * params["bn_scale"]

    # Constants built ONCE (numpy) -- not part of the per-forward path.
    consts = make_constants(params, 16, 16)
    fwd = jax.jit(simple_cnn1_forward)

    out = jax.block_until_ready(fwd(x, consts))
    ref = jax.block_until_ready(reference_forward(x, params))
    assert out.shape == (2, 10)
    np.testing.assert_allclose(np.asarray(out), np.asarray(ref), rtol=1e-3, atol=1e-3)
    print("KERNEL_OK")
</pallas_src>

<mosaic_0001>
module attributes {stable_mosaic.version = 11 : i64} {
  func.func @_fused_kernel(%arg0: i32, %arg1: memref<1x32x72xf32, #tpu.memory_space<vmem>>, %arg2: memref<72x128xf32, #tpu.memory_space<vmem>>, %arg3: memref<1x128xf32, #tpu.memory_space<vmem>>, %arg4: memref<128x384xf32, #tpu.memory_space<vmem>>, %arg5: memref<1x128xf32, #tpu.memory_space<vmem>>, %arg6: memref<32x1xf32, #tpu.memory_space<vmem>>, %arg7: memref<32x1xf32, #tpu.memory_space<vmem>>, %arg8: memref<128x16xf32, #tpu.memory_space<vmem>>, %arg9: memref<128x1xf32, #tpu.memory_space<vmem>>, %arg10: memref<4x32xf32, #tpu.memory_space<vmem>>, %arg11: memref<16x10xf32, #tpu.memory_space<vmem>>, %arg12: memref<1x10xf32, #tpu.memory_space<vmem>>, %arg13: memref<1x1x10xf32, #tpu.memory_space<vmem>>) attributes {dimension_semantics = [#tpu.dimension_semantics<parallel>], iteration_bounds = array<i64: 2>, scalar_prefetch = 0 : i64, scratch_operands = 0 : i64, tpu.core_type = #tpu.core_type<tc>, window_params = [{transform_indices = @transform_0, window_bounds = array<i64: 1, 32, 72>}, {pipeline_mode = #tpu.pipeline_mode<synchronous>, transform_indices = @transform_1, window_bounds = array<i64: 72, 128>}, {pipeline_mode = #tpu.pipeline_mode<synchronous>, transform_indices = @transform_2, window_bounds = array<i64: 1, 128>}, {pipeline_mode = #tpu.pipeline_mode<synchronous>, transform_indices = @transform_3, window_bounds = array<i64: 128, 384>}, {pipeline_mode = #tpu.pipeline_mode<synchronous>, transform_indices = @transform_4, window_bounds = array<i64: 1, 128>}, {pipeline_mode = #tpu.pipeline_mode<synchronous>, transform_indices = @transform_5, window_bounds = array<i64: 32, 1>}, {pipeline_mode = #tpu.pipeline_mode<synchronous>, transform_indices = @transform_6, window_bounds = array<i64: 32, 1>}, {pipeline_mode = #tpu.pipeline_mode<synchronous>, transform_indices = @transform_7, window_bounds = array<i64: 128, 16>}, {pipeline_mode = #tpu.pipeline_mode<synchronous>, transform_indices = @transform_8, window_bounds = array<i64: 128, 1>}, {pipeline_mode = #tpu.pipeline_mode<synchronous>, transform_indices = @transform_9, window_bounds = array<i64: 4, 32>}, {pipeline_mode = #tpu.pipeline_mode<synchronous>, transform_indices = @transform_10, window_bounds = array<i64: 16, 10>}, {pipeline_mode = #tpu.pipeline_mode<synchronous>, transform_indices = @transform_11, window_bounds = array<i64: 1, 10>}, {transform_indices = @transform_12, window_bounds = array<i64: 1, 1, 10>}]} {
    %c0 = arith.constant 0 : index
    %c0_0 = arith.constant 0 : index
    %c0_1 = arith.constant 0 : index
    %0 = vector.load %arg1[%c0, %c0_0, %c0_1] : memref<1x32x72xf32, #tpu.memory_space<vmem>>, vector<1x32x72xf32>
    %1 = vector.shape_cast %0 : vector<1x32x72xf32> to vector<32x72xf32>
    %c0_2 = arith.constant 0 : index
    %c0_3 = arith.constant 0 : index
    %2 = vector.load %arg2[%c0_2, %c0_3] : memref<72x128xf32, #tpu.memory_space<vmem>>, vector<72x128xf32>
    %cst = arith.constant dense<0.000000e+00> : vector<32x128xf32>
    %3 = tpu.matmul %1, %2, %cst {dimension_numbers = #tpu.dot_dimension_numbers<[1], [0], [0], [1], [0, 0, 1, 1], [], []>} : vector<32x72xf32>, vector<72x128xf32>, vector<32x128xf32> -> vector<32x128xf32>
    %c0_4 = arith.constant 0 : index
    %c0_5 = arith.constant 0 : index
    %4 = vector.load %arg3[%c0_4, %c0_5] : memref<1x128xf32, #tpu.memory_space<vmem>>, vector<1x128xf32>
    %5 = vector.broadcast %4 : vector<1x128xf32> to vector<32x128xf32>
    %6 = arith.addf %3, %5 : vector<32x128xf32>
    %cst_6 = arith.constant 0.000000e+00 : f32
    %7 = vector.broadcast %cst_6 : f32 to vector<32x128xf32>
    %8 = arith.cmpf ogt, %6, %7 : vector<32x128xf32>
    %cst_7 = arith.constant 1.000000e-01 : f32
    %9 = vector.broadcast %cst_7 : f32 to vector<32x128xf32>
    %10 = arith.mulf %9, %6 : vector<32x128xf32>
    %11 = arith.select %8, %6, %10 : vector<32x128xi1>, vector<32x128xf32>
    %c0_8 = arith.constant 0 : index
    %c0_9 = arith.constant 0 : index
    %12 = vector.load %arg10[%c0_8, %c0_9] : memref<4x32xf32, #tpu.memory_space<vmem>>, vector<4x32xf32>
    %c0_10 = arith.constant 0 : index
    %c0_11 = arith.constant 0 : index
    %13 = vector.load %arg8[%c0_10, %c0_11] : memref<128x16xf32, #tpu.memory_space<vmem>>, vector<128x16xf32>
    %cst_12 = arith.constant dense<0.000000e+00> : vector<32x16xf32>
    %14 = tpu.matmul %11, %13, %cst_12 {dimension_numbers = #tpu.dot_dimension_numbers<[1], [0], [0], [1], [0, 0, 1, 1], [], []>} : vector<32x128xf32>, vector<128x16xf32>, vector<32x16xf32> -> vector<32x16xf32>
    %cst_13 = arith.constant dense<0.000000e+00> : vector<4x16xf32>
    %15 = tpu.matmul %12, %14, %cst_13 {dimension_numbers = #tpu.dot_dimension_numbers<[1], [0], [0], [1], [0, 0, 1, 1], [], []>} : vector<4x32xf32>, vector<32x16xf32>, vector<4x16xf32> -> vector<4x16xf32>
    %c0_14 = arith.constant 0 : index
    %c0_15 = arith.constant 0 : index
    %16 = vector.load %arg4[%c0_14, %c0_15] : memref<128x384xf32, #tpu.memory_space<vmem>>, vector<128x384xf32>
    %cst_16 = arith.constant dense<0.000000e+00> : vector<32x384xf32>
    %17 = tpu.matmul %11, %16, %cst_16 {dimension_numbers = #tpu.dot_dimension_numbers<[1], [0], [0], [1], [0, 0, 1, 1], [], []>} : vector<32x128xf32>, vector<128x384xf32>, vector<32x384xf32> -> vector<32x384xf32>
    %18 = vector.extract_strided_slice %17 {offsets = [0, 128], sizes = [32, 128], strides = [1, 1]} : vector<32x384xf32> to vector<32x128xf32>
    %c0_17 = arith.constant 0 : index
    %c0_18 = arith.constant 0 : index
    %19 = vector.load %arg6[%c0_17, %c0_18] : memref<32x1xf32, #tpu.memory_space<vmem>>, vector<32x1xf32>
    %20 = vector.extract_strided_slice %17 {offsets = [0, 0], sizes = [32, 128], strides = [1, 1]} : vector<32x384xf32> to vector<32x128xf32>
    %c1_i32 = arith.constant 1 : i32
    %21 = tpu.dynamic_rotate %20 by %c1_i32 dim 0 : vector<32x128xf32>, i32 -> vector<32x128xf32>
    %22 = vector.broadcast %19 : vector<32x1xf32> to vector<32x128xf32>
    %23 = arith.mulf %22, %21 : vector<32x128xf32>
    %24 = arith.addf %18, %23 : vector<32x128xf32>
    %c0_19 = arith.constant 0 : index
    %c0_20 = arith.constant 0 : index
    %25 = vector.load %arg7[%c0_19, %c0_20] : memref<32x1xf32, #tpu.memory_space<vmem>>, vector<32x1xf32>
    %26 = vector.extract_strided_slice %17 {offsets = [0, 256], sizes = [32, 128], strides = [1, 1]} : vector<32x384xf32> to vector<32x128xf32>
    %c31_i32 = arith.constant 31 : i32
    %27 = tpu.dynamic_rotate %26 by %c31_i32 dim 0 : vector<32x128xf32>, i32 -> vector<32x128xf32>
    %28 = vector.broadcast %25 : vector<32x1xf32> to vector<32x128xf32>
    %29 = arith.mulf %28, %27 : vector<32x128xf32>
    %30 = arith.addf %24, %29 : vector<32x128xf32>
    %c0_21 = arith.constant 0 : index
    %c0_22 = arith.constant 0 : index
    %31 = vector.load %arg5[%c0_21, %c0_22] : memref<1x128xf32, #tpu.memory_space<vmem>>, vector<1x128xf32>
    %32 = vector.broadcast %31 : vector<1x128xf32> to vector<32x128xf32>
    %33 = arith.addf %30, %32 : vector<32x128xf32>
    %cst_23 = arith.constant 0.000000e+00 : f32
    %34 = vector.broadcast %cst_23 : f32 to vector<32x128xf32>
    %35 = arith.maximumf %33, %34 : vector<32x128xf32>
    %c0_24 = arith.constant 0 : index
    %c0_25 = arith.constant 0 : index
    %36 = vector.load %arg10[%c0_24, %c0_25] : memref<4x32xf32, #tpu.memory_space<vmem>>, vector<4x32xf32>
    %c0_26 = arith.constant 0 : index
    %c0_27 = arith.constant 0 : index
    %37 = vector.load %arg9[%c0_26, %c0_27] : memref<128x1xf32, #tpu.memory_space<vmem>>, vector<128x1xf32>
    %cst_28 = arith.constant dense<0.000000e+00> : vector<32x1xf32>
    %38 = tpu.matmul %35, %37, %cst_28 {dimension_numbers = #tpu.dot_dimension_numbers<[1], [0], [0], [1], [0, 0, 1, 1], [], []>} : vector<32x128xf32>, vector<128x1xf32>, vector<32x1xf32> -> vector<32x1xf32>
    %cst_29 = arith.constant dense<0.000000e+00> : vector<4x1xf32>
    %39 = tpu.matmul %36, %38, %cst_29 {dimension_numbers = #tpu.dot_dimension_numbers<[1], [0], [0], [1], [0, 0, 1, 1], [], []>} : vector<4x32xf32>, vector<32x1xf32>, vector<4x1xf32> -> vector<4x1xf32>
    %40 = tpu.iota {dimensions = array<i32: 0>} : vector<4x1xi32>
    %cst_30 = arith.constant dense<0xFF800000> : vector<1xf32>
    %41 = vector.multi_reduction <maximumf>, %39, %cst_30 [0] : vector<4x1xf32> to vector<1xf32>
    %42 = vector.shape_cast %41 : vector<1xf32> to vector<1x1xf32>
    %43 = vector.broadcast %42 : vector<1x1xf32> to vector<4x1xf32>
    %44 = arith.cmpf oge, %39, %43 : vector<4x1xf32>
    %c4_i32 = arith.constant 4 : i32
    %45 = vector.broadcast %c4_i32 : i32 to vector<4x1xi32>
    %46 = arith.select %44, %40, %45 : vector<4x1xi1>, vector<4x1xi32>
    %cst_31 = arith.constant dense<2147483647> : vector<1xi32>
    %47 = vector.multi_reduction <minsi>, %46, %cst_31 [0] : vector<4x1xi32> to vector<1xi32>
    %48 = vector.shape_cast %47 : vector<1xi32> to vector<1x1xi32>
    %49 = vector.broadcast %48 : vector<1x1xi32> to vector<4x1xi32>
    %50 = arith.cmpi eq, %40, %49 : vector<4x1xi32>
    %51 = arith.extui %50 : vector<4x1xi1> to vector<4x1xi32>
    %52 = arith.sitofp %51 : vector<4x1xi32> to vector<4x1xf32>
    %53 = vector.broadcast %52 : vector<4x1xf32> to vector<4x16xf32>
    %54 = arith.mulf %53, %15 : vector<4x16xf32>
    %cst_32 = arith.constant dense<0.000000e+00> : vector<16xf32>
    %55 = vector.multi_reduction <add>, %54, %cst_32 [0] : vector<4x16xf32> to vector<16xf32>
    %56 = vector.shape_cast %55 : vector<16xf32> to vector<1x16xf32>
    %c0_33 = arith.constant 0 : index
    %c0_34 = arith.constant 0 : index
    %57 = vector.load %arg11[%c0_33, %c0_34] : memref<16x10xf32, #tpu.memory_space<vmem>>, vector<16x10xf32>
    %cst_35 = arith.constant dense<0.000000e+00> : vector<1x10xf32>
    %58 = tpu.matmul %56, %57, %cst_35 {dimension_numbers = #tpu.dot_dimension_numbers<[1], [0], [0], [1], [0, 0, 1, 1], [], []>} : vector<1x16xf32>, vector<16x10xf32>, vector<1x10xf32> -> vector<1x10xf32>
    %c0_36 = arith.constant 0 : index
    %c0_37 = arith.constant 0 : index
    %59 = vector.load %arg12[%c0_36, %c0_37] : memref<1x10xf32, #tpu.memory_space<vmem>>, vector<1x10xf32>
    %60 = arith.addf %58, %59 : vector<1x10xf32>
    %61 = arith.mulf %60, %60 : vector<1x10xf32>
    %cst_38 = arith.constant dense<0.000000e+00> : vector<1xf32>
    %62 = vector.multi_reduction <add>, %61, %cst_38 [1] : vector<1x10xf32> to vector<1xf32>
    %63 = vector.shape_cast %62 : vector<1xf32> to vector<1x1xf32>
    %cst_39 = arith.constant 1.000000e-24 : f32
    %64 = vector.broadcast %cst_39 : f32 to vector<1x1xf32>
    %65 = arith.maximumf %63, %64 : vector<1x1xf32>
    %66 = math.rsqrt %65 : vector<1x1xf32>
    %67 = vector.broadcast %66 : vector<1x1xf32> to vector<1x10xf32>
    %68 = arith.mulf %60, %67 : vector<1x10xf32>
    %c0_40 = arith.constant 0 : index
    %c0_41 = arith.constant 0 : index
    %c0_42 = arith.constant 0 : index
    %69 = vector.load %arg13[%c0_40, %c0_41, %c0_42] : memref<1x1x10xf32, #tpu.memory_space<vmem>>, vector<1x1x10xf32>
    %70 = vector.shape_cast %69 : vector<1x1x10xf32> to vector<1x10xf32>
    %71 = vector.shape_cast %68 : vector<1x10xf32> to vector<1x1x10xf32>
    tpu.vector_store %arg13[%c0_40, %c0_41, %c0_42], %71 {strides = array<i32>} : memref<1x1x10xf32, #tpu.memory_space<vmem>>, vector<1x1x10xf32>,
    return
  }
  func.func @transform_0(%arg0: i32) -> (i32, i32, i32) {
    %c0_i32 = arith.constant 0 : i32
    %c0_i32_0 = arith.constant 0 : i32
    %c0_i32_1 = arith.constant 0 : i32
    return %arg0, %c0_i32, %c0_i32_0 : i32, i32, i32
  }
  func.func @transform_1(%arg0: i32) -> (i32, i32) {
    %c0_i32 = arith.constant 0 : i32
    %c0_i32_0 = arith.constant 0 : i32
    %c0_i32_1 = arith.constant 0 : i32
    return %c0_i32, %c0_i32_0 : i32, i32
  }
  func.func @transform_2(%arg0: i32) -> (i32, i32) {
    %c0_i32 = arith.constant 0 : i32
    %c0_i32_0 = arith.constant 0 : i32
    %c0_i32_1 = arith.constant 0 : i32
    return %c0_i32, %c0_i32_0 : i32, i32
  }
  func.func @transform_3(%arg0: i32) -> (i32, i32) {
    %c0_i32 = arith.constant 0 : i32
    %c0_i32_0 = arith.constant 0 : i32
    %c0_i32_1 = arith.constant 0 : i32
    return %c0_i32, %c0_i32_0 : i32, i32
  }
  func.func @transform_4(%arg0: i32) -> (i32, i32) {
    %c0_i32 = arith.constant 0 : i32
    %c0_i32_0 = arith.constant 0 : i32
    %c0_i32_1 = arith.constant 0 : i32
    return %c0_i32, %c0_i32_0 : i32, i32
  }
  func.func @transform_5(%arg0: i32) -> (i32, i32) {
    %c0_i32 = arith.constant 0 : i32
    %c0_i32_0 = arith.constant 0 : i32
    %c0_i32_1 = arith.constant 0 : i32
    return %c0_i32, %c0_i32_0 : i32, i32
  }
  func.func @transform_6(%arg0: i32) -> (i32, i32) {
    %c0_i32 = arith.constant 0 : i32
    %c0_i32_0 = arith.constant 0 : i32
    %c0_i32_1 = arith.constant 0 : i32
    return %c0_i32, %c0_i32_0 : i32, i32
  }
  func.func @transform_7(%arg0: i32) -> (i32, i32) {
    %c0_i32 = arith.constant 0 : i32
    %c0_i32_0 = arith.constant 0 : i32
    %c0_i32_1 = arith.constant 0 : i32
    return %c0_i32, %c0_i32_0 : i32, i32
  }
  func.func @transform_8(%arg0: i32) -> (i32, i32) {
    %c0_i32 = arith.constant 0 : i32
    %c0_i32_0 = arith.constant 0 : i32
    %c0_i32_1 = arith.constant 0 : i32
    return %c0_i32, %c0_i32_0 : i32, i32
  }
  func.func @transform_9(%arg0: i32) -> (i32, i32) {
    %c0_i32 = arith.constant 0 : i32
    %c0_i32_0 = arith.constant 0 : i32
    %c0_i32_1 = arith.constant 0 : i32
    return %c0_i32, %c0_i32_0 : i32, i32
  }
  func.func @transform_10(%arg0: i32) -> (i32, i32) {
    %c0_i32 = arith.constant 0 : i32
    %c0_i32_0 = arith.constant 0 : i32
    %c0_i32_1 = arith.constant 0 : i32
    return %c0_i32, %c0_i32_0 : i32, i32
  }
  func.func @transform_11(%arg0: i32) -> (i32, i32) {
    %c0_i32 = arith.constant 0 : i32
    %c0_i32_0 = arith.constant 0 : i32
    %c0_i32_1 = arith.constant 0 : i32
    return %c0_i32, %c0_i32_0 : i32, i32
  }
  func.func @transform_12(%arg0: i32) -> (i32, i32, i32) {
    %c0_i32 = arith.constant 0 : i32
    %c0_i32_0 = arith.constant 0 : i32
    %c0_i32_1 = arith.constant 0 : i32
    return %arg0, %c0_i32, %c0_i32_0 : i32, i32, i32
  }
}

</mosaic_0001>

<bundles_post_ra>
// kernel: simple_cnn1_forward.1
= control target key start
LH: loop header
LB: loop body
LE: loop exit
PB: predicated region body
PF: predicated region fallthrough
CT: control target
= control target key end

     0   :  { %s2315_s0 = inlined_call_operand.vmem [shape: f32[2,32,72], index: 0, kind: input, shape index: {}]   ;;  %s2316_s1 = inlined_call_operand.vmem [shape: f32[72,128], index: 1, kind: input, shape index: {}]   ;;  %s2317_s2 = inlined_call_operand.vmem [shape: f32[1,128], index: 2, kind: input, shape index: {}]   ;;  %s2318_s3 = inlined_call_operand.vmem [shape: f32[128,384], index: 3, kind: input, shape index: {}]   ;;  %s2319_s4 = inlined_call_operand.vmem [shape: f32[1,128], index: 4, kind: input, shape index: {}]   ;;  %s2320_s5 = inlined_call_operand.vmem [shape: f32[32,1], index: 5, kind: input, shape index: {}]   ;;  %s2321_s6 = inlined_call_operand.vmem [shape: f32[32,1], index: 6, kind: input, shape index: {}]   ;;  %s2322_s7 = inlined_call_operand.vmem [shape: f32[128,16], index: 7, kind: input, shape index: {}]   ;;  %s2323_s8 = inlined_call_operand.vmem [shape: f32[128,1], index: 8, kind: input, shape index: {}]   ;;  %s2324_s9 = inlined_call_operand.vmem [shape: f32[4,32], index: 9, kind: input, shape index: {}]   ;;  %s2325_s10 = inlined_call_operand.vmem [shape: f32[16,10], index: 10, kind: input, shape index: {}]   ;;  %s2326_s11 = inlined_call_operand.vmem [shape: f32[1,10], index: 11, kind: input, shape index: {}]   ;;  %s2327_s12 = inlined_call_operand.hbm [shape: f32[2,1,10], index: 12, kind: output, shape index: {}]  }
   0x1   :  { %2329 = sst [smem:[#allocation7_spill]] %s2315_s0 }
   0x2   :  { %17 = vsyncpa [#allocation3], 0 }
   0x3   :  { %19 = vsyncpa [#allocation3 + $0x1], 0  ;;  %s1850_s21 = smov 0   ;;  %s1852_s22 = smov 0  }
   0x4   :  { %s1854_s23 = smov 0   ;;  %s1856_s24 = smov 0  }
   0x5 LB: > { %2330 = sst [smem:[#allocation5_spill]] %s1775_s23  ;;  %s1871_s25 = sadd.s32 4294967295, %s1779_s24   ;;  %s1779_s24 = sphi %s1856_s24, %s2339_s24   ;;  %s1775_s23 = sphi %s1854_s23, %s2336_s23   ;;  %s1771_s22 = sphi %s1852_s22, %s2338_s22   ;;  %s1767_s21 = sphi %s1850_s21, %s2337_s21  }
   0x6   : > { %s1400_s26 = sadd.s32 4294967294, %s1779_s24   ;;  %s1875_s27 = sadd.s32 1, %s1779_s24  }
   0x7   : > { %s289_s28 = sadd.s32 1, %s1775_s23  ;;  %s286_s29 = ssub.s32 %s1779_s24, %s1875_s27 }
   0x8   : > { %p299_p0 = scmp.ne.s32.totalorder %s1775_s23, %s1771_s22  ;;  %p287_p1 = scmp.eq.s32.totalorder %s286_s29, 0 }
   0x9   : > { %p300_p2 = scmp.eq.s32.totalorder %s1871_s25, 1  ;;  %p305_p3 = scmp.ne.s32.totalorder %s1771_s22, %s1767_s21 }
   0xa   : > { %p306_p4 = scmp.eq.s32.totalorder %s1400_s26, 1  ;;  %p1403_p7 = scmp.ge.s32.totalorder %s1779_s24, 1 }
   0xb   : > { %s1886_s30 = scalar_select %p287_p1, %s1775_s23, %s289_s28  }
   0xc   : > { %p1888_p5 = por %p300_p2, %p299_p0  ;;  %p1892_p6 = por %p306_p4, %p305_p3 }
   0xd   : > { %2331 = sst [smem:[#allocation6_spill]] %s1886_s30  ;;  %p365_p8 = scmp.lt.s32.totalorder %s1779_s24, 3 }
   0xf   : > { %p366_p9 = pnand %p1403_p7, %p365_p8 }
  0x10   : > { %p406_p10 = scmp.lt.s32.totalorder (!%p366_p9), %s1871_s25, 1  ;;  %s2334_s0 = sld [smem:[#allocation7_spill]] (!%p366_p9) }
  0x11   : > { %369 = sbr.rel (%p366_p9) target bundleno = 1621 (0x655), region = 68  ;;  %s404_s20 = sand.u32 (!%p366_p9), 1, %s1771_s22  }
  0x12   : > { %s1416_s28 = sshll.u32 (!%p366_p9), %s1871_s25, 4  ;;  %s405_s29 = scalar_lea.vmem (!%p366_p9), [#allocation2], %s404_s20 }
  0x13   : > { %s1343_s16 = scalar_lea.hbm (!%p366_p9), %s2327_s12, %s1416_s28 }
  0x16   : > { %v423_v0 = vld [vmem:[%s2316_s1 + $0x40] sm:$0xff]  ;;  %v422_v1 = vld [vmem:[%s2316_s1 + $0x38] sm:$0xff]  ;;  %v421_v2 = vld [vmem:[%s2316_s1 + $0x30] sm:$0xff]  ;;  %s407_s26 = scalar_select %p406_p10, %s1871_s25, 1  ;;  %vm431_vm0 = vcmask 588800   ;;  %v1781_v61 = vmov 0.0  }
  0x17   : > { %1506 = vmatprep.subr.mxu0 %v423_v0  ;;  %v557_v3 = vld [vmem:[%s2322_s7 + $0x78] sm:$0xff]  ;;  %v420_v4 = vld [vmem:[%s2316_s1 + $0x28] sm:$0xff]  ;;  %v556_v5 = vld [vmem:[%s2322_s7 + $0x70] sm:$0xff]  ;;  %vm1783_vm5 = vmmov 0   ;;  %vm643_vm6 = vcmask 261120   ;;  %vm1209_vm9 = vcmask 3072  }
  0x18   : > { %1507 = vmatpush3.msra.mxu0 %v423_v0  ;;  %s1419_s17 = sshll.u32 %s407_s26, 5  ;;  %1530 = vmatprep.subr.mxu1 %v557_v3  ;;  %v419_v6 = vld [vmem:[%s2316_s1 + $0x20] sm:$0xff]  ;;  %v555_v8 = vld [vmem:[%s2322_s7 + $0x68] sm:$0xff]  ;;  %v418_v9 = vld [vmem:[%s2316_s1 + $0x18] sm:$0xff]  ;;  %v1782_v0 = vmov 0   ;;  %vm1238_vm15 = vcmask 125952  }
  0x19   : > { %1508 = vmatprep.subr.mxu0 %v422_v1  ;;  %s1921_s23 = scalar_lea.vmem %s2334_s0, %s1419_s17  ;;  %1531 = vmatpush3.msra.mxu1 %v557_v3  ;;  %v554_v10 = vld [vmem:[%s2322_s7 + $0x60] sm:$0xff]  ;;  %v417_v11 = vld [vmem:[%s2316_s1 + $0x10] sm:$0xff]  ;;  %v553_v12 = vld [vmem:[%s2322_s7 + $0x58] sm:$0xff]  ;;  %s1345_s26 = sshll.u32 %s405_s29, 4  ;;  %s1346_s26 = int_to_ptr.vmem [resolvable:$true] %s1345_s26 }
  0x1a   : > { %1509 = vmatpush3.msra.mxu0 %v422_v1  ;;  %v411_v7 = vld [vmem:[%s1921_s23] sm:$0xff]  ;;  %1532 = vmatprep.subr.mxu1 %v556_v5  ;;  %v416_v13 = vld [vmem:[%s2316_s1 + $0x8] sm:$0xff]  ;;  %v552_v14 = vld [vmem:[%s2322_s7 + $0x50] sm:$0xff]  ;;  %s1333_s17 = scalar_lea.sflag [#allocation3], %s404_s20  ;;  %s1719_s18 = scalar_lea.vmem %s1346_s26, 16 }
  0x1b   : > { %1510 = vmatprep.subr.mxu0 %v421_v2  ;;  %1524 = vmatprep.mubr.msk.f32.mxu0 %vm431_vm0, %v411_v7  ;;  %v415_v15 = vld [vmem:[%s2316_s1] sm:$0xff]  ;;  %v551_v16 = vld [vmem:[%s2322_s7 + $0x48] sm:$0xff]  ;;  %v763_v18 = vld [vmem:[%s2318_s3 + $0x170] sm:$0xff]  ;;  %p1720_p11 = scmp.ne.s32.totalorder %s1346_s26, %s1719_s18 }
  0x1c   : > { %1511 = vmatpush3.msra.mxu0 %v421_v2  ;;  %1533 = vmatpush3.msra.mxu1 %v556_v5  ;;  %v412_v17 = vld [vmem:[%s1921_s23 + $0x8] sm:$0xff]  ;;  %v413_v19 = vld [vmem:[%s1921_s23 + $0x10] sm:$0xff]  ;;  %v760_v21 = vld [vmem:[%s2318_s3 + $0x158] sm:$0xff] }
  0x1d   : > { %1512 = vmatprep.subr.mxu0 %v420_v4  ;;  %1534 = vmatprep.subr.mxu1 %v555_v8  ;;  %v762_v20 = vld [vmem:[%s2318_s3 + $0x168] sm:$0xff]  ;;  %v550_v22 = vld [vmem:[%s2322_s7 + $0x40] sm:$0xff]  ;;  %v759_v23 = vld [vmem:[%s2318_s3 + $0x150] sm:$0xff]  ;;  %p1721_p12 = pnand %p1720_p11, %p1888_p5 }
  0x1e   : > { %1513 = vmatpush3.msra.mxu0 %v420_v4  ;;  %1535 = vmatpush3.msra.mxu1 %v555_v8  ;;  %v414_v24 = vld [vmem:[%s1921_s23 + $0x18] sm:$0xff]  ;;  %v757_v25 = vld [vmem:[%s2318_s3 + $0x140] sm:$0xff]  ;;  %v754_v28 = vld [vmem:[%s2318_s3 + $0x128] sm:$0xff]  ;;  %s1784_s23 = smov [#allocation2]  }
  0x1f   : > { %1514 = vmatprep.subr.mxu0 %v419_v6  ;;  %1536 = vmatprep.subr.mxu1 %v554_v10  ;;  %v756_v26 = vld [vmem:[%s2318_s3 + $0x138] sm:$0xff]  ;;  %v753_v29 = vld [vmem:[%s2318_s3 + $0x120] sm:$0xff]  ;;  %v548_v30 = vld [vmem:[%s2322_s7 + $0x30] sm:$0xff]  ;;  %p1722_p13 = pneg %p1721_p12  ;;  %s1723_s19 = sshll.u32 %s1784_s23, 4  ;;  %s1724_s19 = int_to_ptr.vmem [resolvable:$false] %s1723_s19 }
  0x20   : > { %1515 = vmatpush3.msra.mxu0 %v419_v6  ;;  %1537 = vmatpush3.msra.mxu1 %v554_v10  ;;  %v549_v27 = vld [vmem:[%s2322_s7 + $0x38] sm:$0xff]  ;;  %v751_v31 = vld [vmem:[%s2318_s3 + $0x110] sm:$0xff]  ;;  %v750_v32 = vld [vmem:[%s2318_s3 + $0x108] sm:$0xff]  ;;  %s1725_s25 = scalar_lea.vmem %s1724_s19, 32  ;;  %p1726_p0 = scmp.lt.s32.totalorder %s1346_s26, %s1724_s19 }
  0x21   : > { %1516 = vmatprep.subr.mxu0 %v418_v9  ;;  %1538 = vmatprep.subr.mxu1 %v553_v12  ;;  %v547_v33 = vld [vmem:[%s2322_s7 + $0x28] sm:$0xff]  ;;  %v748_v34 = vld [vmem:[%s2318_s3 + $0xf8] sm:$0xff]  ;;  %v747_v35 = vld [vmem:[%s2318_s3 + $0xf0] sm:$0xff]  ;;  %p1727_p1 = scmp.lt.s32.totalorder %s1725_s25, %s1719_s18 }
  0x22   : > { %1517 = vmatpush3.msra.mxu0 %v418_v9  ;;  %1539 = vmatpush3.msra.mxu1 %v553_v12  ;;  %v546_v36 = vld [vmem:[%s2322_s7 + $0x20] sm:$0xff]  ;;  %v744_v38 = vld [vmem:[%s2318_s3 + $0xd8] sm:$0xff]  ;;  %v742_v39 = vld [vmem:[%s2318_s3 + $0xc8] sm:$0xff] }
  0x23   : > { %1518 = vmatprep.subr.mxu0 %v417_v11  ;;  %1540 = vmatprep.subr.mxu1 %v552_v14  ;;  %v745_v37 = vld [vmem:[%s2318_s3 + $0xe0] sm:$0xff]  ;;  %v739_v41 = vld [vmem:[%s2318_s3 + $0xb0] sm:$0xff]  ;;  %v738_v42 = vld [vmem:[%s2318_s3 + $0xa8] sm:$0xff]  ;;  %p1728_p2 = por %p1727_p1, %p1726_p0 }
  0x24   : > { %1519 = vmatpush3.msra.mxu0 %v417_v11  ;;  %1541 = vmatpush3.msra.mxu1 %v552_v14  ;;  %v741_v40 = vld [vmem:[%s2318_s3 + $0xc0] sm:$0xff]  ;;  %v736_v43 = vld [vmem:[%s2318_s3 + $0x98] sm:$0xff]  ;;  %v735_v44 = vld [vmem:[%s2318_s3 + $0x90] sm:$0xff] }
  0x25   : > { %1520 = vmatprep.subr.mxu0 %v416_v13  ;;  %1542 = vmatprep.subr.mxu1 %v551_v16  ;;  %v733_v45 = vld [vmem:[%s2318_s3 + $0x80] sm:$0xff]  ;;  %v732_v46 = vld [vmem:[%s2318_s3 + $0x78] sm:$0xff]  ;;  %v730_v47 = vld [vmem:[%s2318_s3 + $0x68] sm:$0xff]  ;;  %p1729_p3 = pnand %p1728_p2, %p1722_p13 }
  0x26   : > { %1521 = vmatpush3.msra.mxu0 %v416_v13  ;;  %1543 = vmatpush3.msra.mxu1 %v551_v16  ;;  %v729_v48 = vld [vmem:[%s2318_s3 + $0x60] sm:$0xff]  ;;  %v727_v49 = vld [vmem:[%s2318_s3 + $0x50] sm:$0xff]  ;;  %v545_v50 = vld [vmem:[%s2322_s7 + $0x18] sm:$0xff] }
  0x27   : > { %1522 = vmatprep.subr.mxu0 %v415_v15  ;;  %1544 = vmatprep.subr.mxu1 %v550_v22  ;;  %v726_v51 = vld [vmem:[%s2318_s3 + $0x48] sm:$0xff]  ;;  %v724_v52 = vld [vmem:[%s2318_s3 + $0x38] sm:$0xff]  ;;  %v544_v53 = vld [vmem:[%s2322_s7 + $0x10] sm:$0xff] }
  0x28   : > { %1523 = vmatpush3.msra.mxu0 %v415_v15  ;;  %1545 = vmatpush3.msra.mxu1 %v550_v22  ;;  %v723_v54 = vld [vmem:[%s2318_s3 + $0x30] sm:$0xff]  ;;  %v721_v55 = vld [vmem:[%s2318_s3 + $0x20] sm:$0xff]  ;;  %v543_v56 = vld [vmem:[%s2322_s7 + $0x8] sm:$0xff] }
  0x29   : > { %1525 = vmatmul.mubr.msk.f32.vlgmr.msra.gmra.mxu0 %vm431_vm0, %v412_v17  ;;  %765 = vmatprep.subr.mxu0 %v763_v18  ;;  %v720_v57 = vld [vmem:[%s2318_s3 + $0x18] sm:$0xff]  ;;  %v718_v58 = vld [vmem:[%s2318_s3 + $0x8] sm:$0xff]  ;;  %v542_v59 = vld [vmem:[%s2322_s7] sm:$0xff] }
  0x2a   : > { %1527 = vmatprep.mubr.msk.f32.mxu0 %vm431_vm0, %v413_v19  ;;  %766 = vmatpush1.msra.mxu0 %v762_v20  ;;  %v717_v60 = vld [vmem:[%s2318_s3] sm:$0xff]  ;;  %v940_v1 = vld [vmem:[%s2320_s5 + $0x8] sm:$0xff]  ;;  %v941_v3 = vld [vmem:[%s2320_s5 + $0x10] sm:$0xff] }
  0x2b   : > { %767 = vmatprep.subr.mxu0 %v760_v21  ;;  %1546 = vmatprep.subr.mxu1 %v549_v27  ;;  %v939_v62 = vld [vmem:[%s2320_s5] sm:$0xff]  ;;  %v983_v2 = vld [vmem:[%s2321_s6 + $0x8] sm:$0xff]  ;;  %v942_v4 = vld [vmem:[%s2320_s5 + $0x18] sm:$0xff] }
  0x2c   : > { %768 = vmatpush1.msra.mxu0 %v759_v23  ;;  %1547 = vmatpush3.msra.mxu1 %v549_v27  ;;  %v982_v63 = vld [vmem:[%s2321_s6] sm:$0xff]  ;;  %v984_v22 = vld [vmem:[%s2321_s6 + $0x10] sm:$0xff]  ;;  %v985_v23 = vld [vmem:[%s2321_s6 + $0x18] sm:$0xff] }
  0x2d   : > { %1528 = vmatmul.mubr.msk.f32.gmra.mxu0 %vm431_vm0, %v414_v24  ;;  %769 = vmatprep.subr.mxu0 %v757_v25  ;;  %v1406_v5 = vld [vmem:[%s2317_s2] ss:$0 sm:$0xff]  ;;  %vm1249_vm0 = vcmask 130048  }
  0x2e   : > { %770 = vmatpush1.msra.mxu0 %v756_v26  ;;  %1548 = vmatprep.subr.mxu1 %v548_v30 }
  0x2f   : > { %771 = vmatprep.subr.mxu0 %v754_v28  ;;  %1549 = vmatpush3.msra.mxu1 %v548_v30  ;;  %v2135_v28 = vld [vmem:[%s2324_s9] sm:$0xf] }
  0x30   : > { %772 = vmatpush1.msra.mxu0 %v753_v29  ;;  %1550 = vmatprep.subr.mxu1 %v547_v33  ;;  %v764_v29 = vld [vmem:[%s2318_s3 + $0x178] sm:$0xff]  ;;  %v761_v30 = vld [vmem:[%s2318_s3 + $0x160] sm:$0xff] }
  0x31   : > { %773 = vmatprep.subr.mxu0 %v751_v31  ;;  %1551 = vmatpush3.msra.mxu1 %v547_v33  ;;  %v758_v31 = vld [vmem:[%s2318_s3 + $0x148] sm:$0xff]  ;;  %v752_v33 = vld [vmem:[%s2318_s3 + $0x118] sm:$0xff] }
  0x32   : > { %774 = vmatpush1.msra.mxu0 %v750_v32  ;;  %1552 = vmatprep.subr.mxu1 %v546_v36  ;;  %v755_v32 = vld [vmem:[%s2318_s3 + $0x130] sm:$0xff] }
  0x33   : > { %775 = vmatprep.subr.mxu0 %v748_v34  ;;  %1553 = vmatpush3.msra.mxu1 %v546_v36  ;;  %v749_v34 = vld [vmem:[%s2318_s3 + $0x100] sm:$0xff]  ;;  %v743_v36 = vld [vmem:[%s2318_s3 + $0xd0] sm:$0xff] }
  0x34   : > { %776 = vmatpush1.msra.mxu0 %v747_v35  ;;  %1554 = vmatprep.subr.mxu1 %v545_v50  ;;  %v746_v35 = vld [vmem:[%s2318_s3 + $0xe8] sm:$0xff] }
  0x35   : > { %777 = vmatprep.subr.mxu0 %v745_v37  ;;  %1555 = vmatpush3.msra.mxu1 %v545_v50  ;;  %v740_v37 = vld [vmem:[%s2318_s3 + $0xb8] sm:$0xff]  ;;  %v1048_v50 = vld [vmem:[%s2323_s8 + $0x50] sm:$0xff] }
  0x36   : > { %778 = vmatpush1.msra.mxu0 %v744_v38  ;;  %1556 = vmatprep.subr.mxu1 %v544_v53  ;;  %v737_v38 = vld [vmem:[%s2318_s3 + $0xa0] sm:$0xff] }
  0x37   : > { %779 = vmatprep.subr.mxu0 %v742_v39  ;;  %1557 = vmatpush3.msra.mxu1 %v544_v53  ;;  %v734_v39 = vld [vmem:[%s2318_s3 + $0x88] sm:$0xff]  ;;  %v1045_v53 = vld [vmem:[%s2323_s8 + $0x38] sm:$0xff] }
  0x38   : > { %780 = vmatpush1.msra.mxu0 %v741_v40  ;;  %1558 = vmatprep.subr.mxu1 %v543_v56  ;;  %v731_v40 = vld [vmem:[%s2318_s3 + $0x70] sm:$0xff] }
  0x39   : > { %781 = vmatprep.subr.mxu0 %v739_v41  ;;  %1559 = vmatpush3.msra.mxu1 %v543_v56  ;;  %v728_v41 = vld [vmem:[%s2318_s3 + $0x58] sm:$0xff]  ;;  %v1042_v56 = vld [vmem:[%s2323_s8 + $0x20] sm:$0xff] }
  0x3a   : > { %782 = vmatpush1.msra.mxu0 %v738_v42  ;;  %1560 = vmatprep.subr.mxu1 %v542_v59  ;;  %v725_v42 = vld [vmem:[%s2318_s3 + $0x40] sm:$0xff] }
  0x3b   : > { %783 = vmatprep.subr.mxu0 %v736_v43  ;;  %829 = vmatprep.mubr.f32.mxu0 %v1781_v61  ;;  %v722_v43 = vld [vmem:[%s2318_s3 + $0x28] sm:$0xff] }
  0x3c   : > { %784 = vmatpush1.msra.mxu0 %v735_v44  ;;  %1561 = vmatpush3.msra.mxu1 %v542_v59  ;;  %v719_v44 = vld [vmem:[%s2318_s3 + $0x10] sm:$0xff]  ;;  %v1039_v59 = vld [vmem:[%s2323_s8 + $0x8] sm:$0xff] }
  0x3d   : > { %785 = vmatprep.subr.mxu0 %v733_v45  ;;  %1568 = vmatprep.subr.mxu1 %v1781_v61  ;;  %v1053_v45 = vld [vmem:[%s2323_s8 + $0x78] sm:$0xff] }
  0x3e   : > { %786 = vmatpush1.msra.mxu0 %v732_v46  ;;  %1715 = vset.pattern.permute.xlu0 %v1782_v0  ;;  %v1052_v46 = vld [vmem:[%s2323_s8 + $0x70] sm:$0xff] }
  0x3f   : > { %787 = vmatprep.subr.mxu0 %v730_v47  ;;  %1716 = vset.pattern.permute.xlu1 %v1782_v0  ;;  %v1051_v47 = vld [vmem:[%s2323_s8 + $0x68] sm:$0xff] }
  0x40   : > { %788 = vmatpush1.msra.mxu0 %v729_v48  ;;  %956 = vperm.xlu0 %1715, %v939_v62   ;;  %v1050_v48 = vld [vmem:[%s2323_s8 + $0x60] sm:$0xff] }
  0x41   : > { %789 = vmatprep.subr.mxu0 %v727_v49  ;;  %997 = vperm.xlu1 %1716, %v982_v63   ;;  %v1049_v49 = vld [vmem:[%s2323_s8 + $0x58] sm:$0xff] }
  0x42   : > { %790 = vmatpush1.msra.mxu0 %v726_v51  ;;  %v1047_v51 = vld [vmem:[%s2323_s8 + $0x48] sm:$0xff] }
  0x43   : > { %791 = vmatprep.subr.mxu0 %v724_v52  ;;  %v1046_v52 = vld [vmem:[%s2323_s8 + $0x40] sm:$0xff] }
  0x44   : > { %792 = vmatpush1.msra.mxu0 %v723_v54  ;;  %961 = vperm.xlu0 %1715, %v940_v1   ;;  %v1044_v54 = vld [vmem:[%s2323_s8 + $0x30] sm:$0xff] }
  0x45   : > { %793 = vmatprep.subr.mxu0 %v721_v55  ;;  %1002 = vperm.xlu1 %1716, %v983_v2   ;;  %v1043_v55 = vld [vmem:[%s2323_s8 + $0x28] sm:$0xff] }
  0x46   : > { %794 = vmatpush1.msra.mxu0 %v720_v57  ;;  %v1041_v57 = vld [vmem:[%s2323_s8 + $0x18] sm:$0xff] }
  0x47   : > { %795 = vmatprep.subr.mxu0 %v718_v58  ;;  %v1040_v58 = vld [vmem:[%s2323_s8 + $0x10] sm:$0xff] }
  0x48   : > { %796 = vmatpush1.msra.mxu0 %v717_v60  ;;  %966 = vperm.xlu0 %1715, %v941_v3   ;;  %v1038_v60 = vld [vmem:[%s2323_s8] sm:$0xff] }
  0x49   : > { %971 = vperm.xlu1 %1716, %v942_v4   ;;  %1617 = vmatprep.subr.mxu0 %v1053_v45 }
  0x4c   : > { %1007 = vperm.xlu0 %1715, %v984_v22  }
  0x4d   : > { %1012 = vperm.xlu1 %1716, %v985_v23  }
  0xe9   : > { %v1526_v6 = vpop.f32.mrf.mxu0 }
  0xea   : > { %v516_v7 = vadd.f32 %v1526_v6, %v1406_v5  ;;  %v957_v6 = vpop.permute.xlu0 %956 }
  0xeb   : > { %v510_v8 = vpop.f32.mrf.mxu0 }
  0xec   : > { %v511_v9 = vadd.f32 %v1406_v5, %v510_v8  ;;  %v534_v10 = vmul.f32 0.1, %v516_v7  ;;  %vm530_vm2 = vcmp.gt.f32.partialorder %v516_v7, 0.0  ;;  %v998_v8 = vpop.permute.xlu1 %997 }
  0xed   : > { %v1529_v11 = vpop.f32.mrf.mxu0 }
  0xee   : > { %v533_v12 = vmul.f32 0.1, %v511_v9  ;;  %v526_v13 = vadd.f32 %v1529_v11, %v1406_v5  ;;  %vm529_vm1 = vcmp.gt.f32.partialorder %v511_v9, 0.0  ;;  %v2107_v18 = vsel %vm530_vm2, %v516_v7, %v534_v10 }
  0xef   : > { %v520_v14 = vpop.f32.mrf.mxu0  ;;  %v947_v7 = vlaneseq }
  0xf0   : > { %v521_v15 = vadd.f32 %v1406_v5, %v520_v14  ;;  %v537_v16 = vsel %vm529_vm1, %v511_v9, %v533_v12  ;;  %v536_v17 = vmul.f32 0.1, %v526_v13  ;;  %vm532_vm4 = vcmp.gt.f32.partialorder %v526_v13, 0.0  ;;  %v962_v12 = vpop.permute.xlu0 %961  ;;  %v1003_v14 = vpop.permute.xlu1 %1002 }
  0xf1   : > { %1562 = vmatprep.mubr.f32.mxu1 %v537_v16  ;;  %830 = vmatmul.mubr.f32.vlgmr.msra.gmra.mxu0 %v537_v16  ;;  %v2244_v10 = vshrl.u32 %v947_v7, 7  ;;  %vm1324_vm1 = vcmask 73728  }
  0xf2   : > { %v535_v19 = vmul.f32 0.1, %v521_v15  ;;  %1563 = vmatmul.mubr.f32.vlgmr.msra.gmra.mxu1 %v2107_v18  ;;  %835 = vmatprep.mubr.f32.mxu0 %v1781_v61  ;;  %vm531_vm3 = vcmp.gt.f32.partialorder %v521_v15, 0.0  ;;  %v2115_v21 = vsel %vm532_vm4, %v526_v13, %v536_v17 }
  0xf3   : > { %1618 = vmatpush3.msra.mxu0 %v1053_v45  ;;  %vm949_vm7 = vcmp.lt.s32.totalorder %v2244_v10, 1  ;;  %vm990_vm8 = vcmp.lt.s32.totalorder %v2244_v10, 7 }
  0xf4   : > { %v2111_v20 = vsel %vm531_vm3, %v521_v15, %v535_v19  ;;  %1619 = vmatprep.subr.mxu0 %v1052_v46 }
  0xf5   : > { %1565 = vmatprep.mubr.f32.mxu1 %v2111_v20  ;;  %836 = vmatmul.mubr.f32.gmra.mxu0 %v2107_v18 }
  0xf6   : > { %1566 = vmatmul.mubr.f32.gmra.mxu1 %v2115_v21  ;;  %841 = vmatprep.mubr.f32.mxu0 %v1781_v61 }
  0xf7   : > { %1576 = vmatprep.mubr.msk.f32.mxu1 %vm1783_vm5, %v1781_v61  ;;  %1620 = vmatpush3.msra.mxu0 %v1052_v46 }
  0xf8   : > { %1621 = vmatprep.subr.mxu0 %v1051_v47 }
  0xf9   : > { %842 = vmatmul.mubr.f32.gmra.mxu0 %v2111_v20 }
  0xfa   : > { %847 = vmatprep.mubr.f32.mxu0 %v1781_v61  ;;  %1622 = vmatpush3.msra.mxu0 %v1051_v47 }
  0xfb   : > { %1623 = vmatprep.subr.mxu0 %v1050_v48 }
  0xfc   : > { %1624 = vmatpush3.msra.mxu0 %v1050_v48 }
  0xfd   : > { %848 = vmatmul.mubr.f32.gmra.mxu0 %v2115_v21  ;;  %1625 = vmatprep.subr.mxu0 %v1049_v49 }
  0xfe   : > { %1626 = vmatpush3.msra.mxu0 %v1049_v49 }
  0xff   : > { %1627 = vmatprep.subr.mxu0 %v1048_v50 }
 0x100   : > { %1628 = vmatpush3.msra.mxu0 %v1048_v50 }
 0x101   : > { %1629 = vmatprep.subr.mxu0 %v1047_v51 }
 0x102   : > { %1630 = vmatpush3.msra.mxu0 %v1047_v51 }
 0x103   : > { %1631 = vmatprep.subr.mxu0 %v1046_v52 }
 0x104   : > { %1632 = vmatpush3.msra.mxu0 %v1046_v52 }
 0x105   : > { %1633 = vmatprep.subr.mxu0 %v1045_v53 }
 0x106   : > { %1634 = vmatpush3.msra.mxu0 %v1045_v53 }
 0x107   : > { %1635 = vmatprep.subr.mxu0 %v1044_v54 }
 0x108   : > { %1636 = vmatpush3.msra.mxu0 %v1044_v54 }
 0x109   : > { %1637 = vmatprep.subr.mxu0 %v1043_v55 }
 0x10a   : > { %1638 = vmatpush3.msra.mxu0 %v1043_v55 }
 0x10b   : > { %1639 = vmatprep.subr.mxu0 %v1042_v56 }
 0x10c   : > { %1640 = vmatpush3.msra.mxu0 %v1042_v56 }
 0x10d   : > { %1641 = vmatprep.subr.mxu0 %v1041_v57 }
 0x10e   : > { %1642 = vmatpush3.msra.mxu0 %v1041_v57 }
 0x10f   : > { %1643 = vmatprep.subr.mxu0 %v1040_v58 }
 0x110   : > { %1644 = vmatpush3.msra.mxu0 %v1040_v58 }
 0x111   : > { %1645 = vmatprep.subr.mxu0 %v1039_v59 }
 0x112   : > { %1646 = vmatpush3.msra.mxu0 %v1039_v59 }
 0x113   : > { %1647 = vmatprep.subr.mxu0 %v1038_v60 }
 0x114   : > { %1648 = vmatpush3.msra.mxu0 %v1038_v60 }
 0x1b1   : > { %v831_v62 = vpop.f32.mrf.mxu0 }
 0x1b2   : > { %v1564_v24 = vpop.f32.mrf.mxu1  ;;  %v943_v13 = vrot.slane %v831_v62, 7 }
 0x1b3   : > { %v833_v1 = vpop.f32.mrf.mxu0 }
 0x1b4   : > { %v624_v25 = vpop.f32.mrf.mxu1 }
 0x1b5   : > { %v837_v2 = vpop.f32.mrf.mxu0 }
 0x1b6   : > { %v1567_v26 = vpop.f32.mrf.mxu1  ;;  %v944_v15 = vrot.slane %v837_v2, 7 }
 0x1b7   : > { %1569 = vmatpush3.msra.mxu1 %v1567_v26  ;;  %v839_v3 = vpop.f32.mrf.mxu0 }
 0x1b8   : > { %v634_v27 = vpop.f32.mrf.mxu1  ;;  %1570 = vmatprep.subr.mxu1 %v1781_v61  ;;  %v952_v19 = vsel %vm949_vm7, %v943_v13, %v944_v15 }
 0x1b9   : > { %1571 = vmatpush3.msra.mxu1 %v634_v27  ;;  %v843_v4 = vpop.f32.mrf.mxu0 }
 0x1ba   : > { %1572 = vmatprep.subr.mxu1 %v1781_v61 }
 0x1bb   : > { %1573 = vmatpush3.msra.mxu1 %v1564_v24  ;;  %v845_v5 = vpop.f32.mrf.mxu0  ;;  %v972_v24 = vpop.permute.xlu1 %971 }
 0x1bc   : > { %1574 = vmatprep.subr.mxu1 %v1781_v61 }
 0x1bd   : > { %1575 = vmatpush3.msra.mxu1 %v624_v25  ;;  %v849_v9 = vpop.f32.mrf.mxu0 }
 0x1be   : > { %1577 = vmatmul.mubr.msk.f32.vlgmr.msra.gmra.mxu1 %vm643_vm6, %v2135_v28  ;;  %1579 = vmatprep.subr.mxu1 %v764_v29  ;;  %v946_v11 = vrot.slane %v849_v9, 7 }
 0x1bf   : > { %1580 = vmatpush3.msra.mxu1 %v764_v29  ;;  %1611 = vmatprep.mubr.f32.mxu1 %v537_v16  ;;  %v945_v16 = vrot.slane %v843_v4, 7  ;;  %v851_v46 = vpop.f32.mrf.mxu0 }
 0x1c0   : > { %1581 = vmatprep.subr.mxu1 %v761_v30  ;;  %v953_v17 = vsel %vm949_vm7, %v946_v11, %v943_v13 }
 0x1c1   : > { %1582 = vmatpush3.msra.mxu1 %v761_v30  ;;  %v974_v22 = vmul.f32 %v957_v6, %v953_v17  ;;  %v950_v25 = vsel %vm949_vm7, %v945_v16, %v946_v11  ;;  %v975_v30 = vmul.f32 %v962_v12, %v952_v19 }
 0x1c2   : > { %1583 = vmatprep.subr.mxu1 %v758_v31 }
 0x1c3   : > { %1584 = vmatpush3.msra.mxu1 %v758_v31 }
 0x1c4   : > { %1585 = vmatprep.subr.mxu1 %v755_v32 }
 0x1c5   : > { %1586 = vmatpush3.msra.mxu1 %v755_v32 }
 0x1c6   : > { %1587 = vmatprep.subr.mxu1 %v752_v33 }
 0x1c7   : > { %1588 = vmatpush3.msra.mxu1 %v752_v33 }
 0x1c8   : > { %1589 = vmatprep.subr.mxu1 %v749_v34 }
 0x1c9   : > { %1590 = vmatpush3.msra.mxu1 %v749_v34  ;;  %v978_v34 = vadd.f32 %v974_v22, %v833_v1 }
 0x1ca   : > { %1591 = vmatprep.subr.mxu1 %v746_v35 }
 0x1cb   : > { %1592 = vmatpush3.msra.mxu1 %v746_v35  ;;  %v977_v35 = vmul.f32 %v972_v24, %v950_v25  ;;  %v1247_v24 = vld [vmem:[%s2325_s10 + $0x8] sm:$0xff]  ;;  %v1246_v25 = vld [vmem:[%s2325_s10] sm:$0xff] }
 0x1cc   : > { %1593 = vmatprep.subr.mxu1 %v743_v36 }
 0x1cd   : > { %1594 = vmatpush3.msra.mxu1 %v743_v36  ;;  %v981_v50 = vadd.f32 %v977_v35, %v851_v46 }
 0x1ce   : > { %1595 = vmatprep.subr.mxu1 %v740_v37 }
 0x1cf   : > { %1596 = vmatpush3.msra.mxu1 %v740_v37 }
 0x1d0   : > { %1597 = vmatprep.subr.mxu1 %v737_v38 }
 0x1d1   : > { %1598 = vmatpush3.msra.mxu1 %v737_v38  ;;  %v1013_v38 = vpop.permute.xlu1 %1012 }
 0x1d2   : > { %1599 = vmatprep.subr.mxu1 %v734_v39 }
 0x1d3   : > { %1600 = vmatpush3.msra.mxu1 %v734_v39 }
 0x1d4   : > { %1601 = vmatprep.subr.mxu1 %v731_v40 }
 0x1d5   : > { %1602 = vmatpush3.msra.mxu1 %v731_v40 }
 0x1d6   : > { %1603 = vmatprep.subr.mxu1 %v728_v41 }
 0x1d7   : > { %1604 = vmatpush3.msra.mxu1 %v728_v41  ;;  %v1412_v41 = vld [vmem:[%s2319_s4] ss:$0 sm:$0xff] }
 0x1d8   : > { %1605 = vmatprep.subr.mxu1 %v725_v42 }
 0x1d9   : > { %1606 = vmatpush3.msra.mxu1 %v725_v42 }
 0x1da   : > { %1607 = vmatprep.subr.mxu1 %v722_v43 }
 0x1db   : > { %1608 = vmatpush3.msra.mxu1 %v722_v43 }
 0x1dc   : > { %1609 = vmatprep.subr.mxu1 %v719_v44 }
 0x1dd   : > { %1610 = vmatpush3.msra.mxu1 %v719_v44  ;;  %v979_v44 = vadd.f32 %v975_v30, %v839_v3 }
 0x1de   : > { %1612 = vmatmul.mubr.f32.vlgmr.msra.gmra.mxu1 %v2107_v18  ;;  %1655 = vmatprep.subr.mxu1 %v1781_v61 }
 0x1df   : > { %1614 = vmatprep.mubr.f32.mxu1 %v2111_v20  ;;  %v967_v20 = vpop.permute.xlu0 %966 }
 0x1e2   : > { %1615 = vmatmul.mubr.f32.gmra.mxu1 %v2115_v21  ;;  %v951_v21 = vsel %vm949_vm7, %v944_v15, %v945_v16 }
 0x1e3   : > { %1663 = vmatprep.mubr.msk.f32.mxu1 %vm1783_vm5, %v1781_v61  ;;  %v976_v31 = vmul.f32 %v967_v20, %v951_v21  ;;  %v1008_v47 = vpop.permute.xlu0 %1007 }
 0x1e5   : > { %v980_v45 = vadd.f32 %v976_v31, %v845_v5 }
 0x27e   : > { %v2242_v63 = vpop.f32.mrf.mxu1 }
 0x280   : > { %v1578_v0 = vpop.f32.mrf.mxu1 }
 0x29e   : > { %v1613_v18 = vpop.f32.mrf.mxu1 }
 0x29f   : > { %v987_v26 = vrot.slane %v1613_v18, 1 }
 0x2a0   : > { %v920_v23 = vpop.f32.mrf.mxu1 }
 0x2a1   : > { %v986_v27 = vrot.slane %v920_v23, 1 }
 0x2a2   : > { %v1616_v29 = vpop.f32.mrf.mxu1 }
 0x2a3   : > { %v993_v32 = vsel %vm990_vm8, %v986_v27, %v987_v26  ;;  %v989_v33 = vrot.slane %v1616_v29, 1 }
 0x2a4   : > { %v1015_v36 = vmul.f32 %v998_v8, %v993_v32  ;;  %v930_v37 = vpop.f32.mrf.mxu1 }
 0x2a5   : > { %v994_v39 = vsel %vm990_vm8, %v989_v33, %v986_v27  ;;  %v988_v40 = vrot.slane %v930_v37, 1 }
 0x2a6   : > { %v1018_v42 = vmul.f32 %v1013_v38, %v994_v39  ;;  %v1019_v43 = vadd.f32 %v1015_v36, %v978_v34 }
 0x2a7   : > { %v991_v48 = vsel %vm990_vm8, %v988_v40, %v989_v33  ;;  %v992_v49 = vsel %vm990_vm8, %v987_v26, %v988_v40 }
 0x2a8   : > { %v1016_v51 = vmul.f32 %v1003_v14, %v992_v49  ;;  %v1017_v52 = vmul.f32 %v1008_v47, %v991_v48  ;;  %v1030_v53 = vadd.f32 %v1412_v41, %v1019_v43  ;;  %v1022_v57 = vadd.f32 %v1018_v42, %v981_v50 }
 0x2aa   : > { %v1020_v54 = vadd.f32 %v1016_v51, %v979_v44  ;;  %v1034_v55 = vmax.f32 %v1030_v53, 0.0  ;;  %v1021_v56 = vadd.f32 %v1017_v52, %v980_v45  ;;  %v1033_v0 = vadd.f32 %v1412_v41, %v1022_v57 }
 0x2ac   : > { %1649 = vmatprep.mubr.f32.mxu0 %v1034_v55  ;;  %v1031_v58 = vadd.f32 %v1412_v41, %v1020_v54  ;;  %v1032_v59 = vadd.f32 %v1412_v41, %v1021_v56  ;;  %v1037_v1 = vmax.f32 %v1033_v0, 0.0 }
 0x2ae   : > { %v1035_v60 = vmax.f32 %v1031_v58, 0.0  ;;  %v1036_v62 = vmax.f32 %v1032_v59, 0.0 }
 0x2b0   : > { %1650 = vmatmul.mubr.f32.vlgmr.msra.gmra.mxu0 %v1035_v60 }
 0x2b1   : > { %1652 = vmatprep.mubr.f32.mxu0 %v1036_v62 }
 0x2b4   : > { %1653 = vmatmul.mubr.f32.gmra.mxu0 %v1037_v1 }
 0x370   : > { %v1651_v2 = vpop.f32.mrf.mxu0 }
 0x372   : > { %v1120_v3 = vpop.f32.mrf.mxu0 }
 0x374   : > { %v1654_v4 = vpop.f32.mrf.mxu0 }
 0x375   : > { %1656 = vmatpush3.msra.mxu1 %v1654_v4 }
 0x376   : > { %v1130_v5 = vpop.f32.mrf.mxu0  ;;  %1657 = vmatprep.subr.mxu1 %v1781_v61 }
 0x377   : > { %1658 = vmatpush3.msra.mxu1 %v1130_v5 }
 0x378   : > { %1659 = vmatprep.subr.mxu1 %v1781_v61 }
 0x379   : > { %1660 = vmatpush3.msra.mxu1 %v1651_v2 }
 0x37a   : > { %1661 = vmatprep.subr.mxu1 %v1781_v61 }
 0x37b   : > { %1662 = vmatpush3.msra.mxu1 %v1120_v3 }
 0x37c   : > { %1664 = vmatmul.mubr.msk.f32.vlgmr.msra.gmra.mxu1 %vm643_vm6, %v2135_v28  ;;  %1666 = vmatprep.subr.mxu1 %v1781_v61 }
 0x37d   : > { %1670 = vmatprep.mubr.msk.f32.mxu1 %vm1783_vm5, %v1781_v61  ;;  %1667 = vmatpush3.msra.mxu1 %v1247_v24 }
 0x37e   : > { %1668 = vmatprep.subr.mxu1 %v1781_v61 }
 0x37f   : > { %1669 = vmatpush3.msra.mxu1 %v1246_v25 }
 0x43c   : > { %v1205_v6 = vpop.f32.mrf.mxu1 }
 0x43d   : > { %v1210_v7 = vsel %vm1209_vm9, %v1205_v6, -inf }
 0x43e   : > { %v1211_v8 = vrot.slane %v1210_v7, 4  ;;  %v1665_v9 = vpop.f32.mrf.mxu1 }
 0x440   : > { %v1212_v11 = vmax.f32 %v1210_v7, %v1211_v8 }
 0x442   : > { %v1213_v12 = vrot.slane %v1212_v11, 2 }
 0x444   : > { %v1214_v13 = vmax.f32 %v1212_v11, %v1213_v12 }
 0x446   : > { %v1215_v14 = vrot.slane %v1214_v13, 1 }
 0x448   : > { %v1216_v15 = vmax.f32 %v1214_v13, %v1215_v14 }
 0x44a   : > { %vm1217_vm10 = vcmp.ge.f32.partialorder %v1205_v6, %v1216_v15 }
 0x44b   : > { %v1218_v16 = vsel %vm1217_vm10, %v2244_v10, 4 }
 0x44c   : > { %v1219_v17 = vsel %vm1209_vm9, %v1218_v16, 2147483647 }
 0x44d   : > { %v1220_v28 = vrot.slane %v1219_v17, 4 }
 0x44f   : > { %vm1221_vm11 = vcmp.lt.s32.totalorder %v1219_v17, %v1220_v28 }
 0x450   : > { %v1222_v18 = vsel %vm1221_vm11, %v1219_v17, %v1220_v28 }
 0x451   : > { %v1223_v19 = vrot.slane %v1222_v18, 2 }
 0x453   : > { %vm1224_vm12 = vcmp.lt.s32.totalorder %v1222_v18, %v1223_v19 }
 0x454   : > { %v1225_v20 = vsel %vm1224_vm12, %v1222_v18, %v1223_v19 }
 0x455   : > { %v1226_v21 = vrot.slane %v1225_v20, 1 }
 0x457   : > { %vm1227_vm13 = vcmp.lt.s32.totalorder %v1225_v20, %v1226_v21 }
 0x458   : > { %v1228_v22 = vsel %vm1227_vm13, %v1225_v20, %v1226_v21 }
 0x459   : > { %vm1229_vm14 = vcmp.eq.s32.totalorder %v2244_v10, %v1228_v22 }
 0x45a   : > { %v1414_v23 = vsel %vm1229_vm14, 1.0, %v1781_v61  ;;  %v1248_v61 = vld [vmem:[%s2326_s11] sm:$0x1] }
 0x45b   : > { %1234 = vperm.xlu0 %1715, %v1414_v23  }
 0x4d6   : > { %v1235_v26 = vpop.permute.xlu0 %1234 }
 0x4d7   : > { %v1237_v27 = vmul.f32 %v1235_v26, %v2242_v63 }
 0x4d9   : > { %v1239_v10 = vsel %vm1238_vm15, %v1237_v27, 0.0 }
 0x4da   : > { %v1240_v29 = vrot.slane %v1239_v10, 4 }
 0x4dc   : > { %v1241_v30 = vadd.f32 %v1240_v29, %v1239_v10 }
 0x4de   : > { %v1242_v31 = vrot.slane %v1241_v30, 2 }
 0x4e0   : > { %v1243_v32 = vadd.f32 %v1242_v31, %v1241_v30 }
 0x4e2   : > { %v1244_v33 = vrot.slane %v1243_v32, 1 }
 0x4e4   : > { %v1245_v34 = vadd.f32 %v1244_v33, %v1243_v32 }
 0x4e6   : > { %1671 = vmatmul.mubr.msk.f32.vlgmr.msra.gmra.mxu1 %vm1249_vm0, %v1245_v34 }
 0x5a6   : > { %v1319_v35 = vpop.f32.mrf.mxu1 }
 0x5a7   : > { %v1320_v36 = vadd.f32 %v1319_v35, %v1248_v61 }
 0x5a8   : > { %v1672_v37 = vpop.f32.mrf.mxu1 }
 0x5a9   : > { %v1323_v63 = vmul.f32 %v1320_v36, %v1320_v36 }
 0x5ab   : > { %v1325_v38 = vsel %vm1324_vm1, %v1323_v63, 0.0 }
 0x5ac   : > { %1326 = vadd.xlane.f32.xlu1 %v1325_v38 }
 0x635   : > { %v1327_v39 = vpop.xlane.xlu1 %1326 }
 0x636   : > { %v1328_v40 = vmax.f32 %v1327_v39, 1e-24 }
 0x638   : > { %1717 = vrsqrt.f32 %v1328_v40 }
 0x645   : > { %v1718_v41 = vpop.eup %1717 }
 0x646   : > { %v1330_v42 = vmul.f32 %v1718_v41, %v1320_v36 }
 0x648   : > { %1331 = vst.msk [vmem:[%s405_s29] sm:$0x1] %vm1324_vm1, %v1330_v42 }
 0x649   : > { %1732 = shalt.err (!%p1729_p3)
}
 0x64a   : > { %s1733_s0 = scalar_lea.hbm %s1343_s16, 16  ;;  %s1737_s29 = scalar_lea.hbm %s2327_s12, 32 }
 0x64b   : > { %p1734_p4 = scmp.ne.s32.totalorder %s1343_s16, %s1733_s0  ;;  %p1738_p9 = scmp.lt.s32.totalorder %s1343_s16, %s2327_s12 }
 0x64c   : > { %p1739_p10 = scmp.lt.s32.totalorder %s1737_s29, %s1733_s0 }
 0x64d   : > { %p1735_p7 = pnand %p1734_p4, %p1888_p5 }
 0x64e   : > { %p1740_p11 = por %p1739_p10, %p1738_p9 }
 0x64f   : > { %p1736_p8 = pneg %p1735_p7 }
 0x651   : > { %p1741_p12 = pnand %p1740_p11, %p1736_p8 }
 0x653   : > { %1744 = shalt.err (!%p1741_p12)
}
 0x654   : > { %1673 = dma.vmem_to_hbm [thread:$0]  (%p1888_p5), %s1346_s26, 16, %s1343_s16, %s1333_s17  }
 0x655 PF: > { %p1679_p13 = scmp.ge.s32.totalorder %s1779_s24, 2  ;;  %s1357_s18 = sand.u32 1, %s1767_s21  }
 0x656   : > { %s1358_s23 = scalar_lea.sflag [#allocation3], %s1357_s18 }
 0x657   : > { %p1676_p0 = pnand %p1679_p13, %p1892_p6 }
 0x659   : > { %p1677_p1 = pneg %p1676_p0 }
 0x65b   : > { %1762 = dma.done.wait (%p1677_p1), %s1358_s23, 16  }
 0x65c   : > { %1764 = vsyncadd (%p1677_p1), %s1358_s23, 4294967280  ;;  %s2335_s0 = sld [smem:[#allocation5_spill]]  ;;  %p22_p2 = scmp.ge.s32.totalorder %s1875_s27, 4  }
 0x65d   : > { %s2336_s23 = sld [smem:[#allocation6_spill]]  ;;  %s2337_s21 = smov %s1771_s22 }
 0x65e   : > { %s2339_s24 = smov %s1875_s27  ;;  %24 = sbr.rel (!%p22_p2) target bundleno = 5 (0x5), region = 103 }
 0x662   : > { %s2338_s22 = smov %s2335_s0 }
 0x663   :  { %1362 = vsyncpa [#allocation3], 1 }
 0x664   :  { %1364 = vsyncpa [#allocation3 + $0x1], 1 }

</bundles_post_ra>
